<compile_context>
chip_gen: v7x
topology: tpu7x:2x2x1
jax: 0.10.0
libtpu: 0.0.40
codegen_flags: <defaults>
</compile_context>

<pallas_src>
import functools

import jax
import jax.numpy as jnp
from jax.experimental import pallas as pl
from jax.experimental.pallas import tpu as pltpu


LANE = 128
# 4096 x 128 f32 = 2 MiB per block. forward double-buffers in+out -> 8 MiB;
# encode_image double-buffers only its streamed input -> ~4 MiB. Fits every
# generation once scoped VMEM is raised to 32 MiB (v6e/v7x default already 32).
MAX_TILE_ROWS = 4096
VMEM_LIMIT_BYTES = 32 * 1024 * 1024


def _cdiv(a, b):
    return -(-a // b)


def _lane_slab(x):
    """View x as a lane-dense [rows, 128] slab.

    Common case (numel % 128 == 0): pure metadata reshape, no extra HBM pass.
    Ragged case: a small (<128 elem) zero pad; zeros are sum-safe.
    Returns (slab, n_true_elems, rows, tile_rows).
    """
    flat = x.reshape(-1)
    n = int(flat.shape[0])
    rows = _cdiv(n, LANE)
    pad = rows * LANE - n
    if pad:
        flat = jnp.pad(flat, (0, pad))          # rare ragged fallback
    slab = flat.reshape(rows, LANE)
    # Single block == full array dims is always a legal block shape (any dtype);
    # the multi-block tile (4096) is a multiple of 32 sublanes, so it also
    # satisfies the packed-dtype (16,128)/(32,128) tiling for bf16/int8.
    tile_rows = rows if rows <= MAX_TILE_ROWS else MAX_TILE_ROWS
    return slab, n, rows, tile_rows


# ----------------------------------------------------------------------------
# forward(x) = x  -- lane-dense tiled copy at HBM roofline.
# ----------------------------------------------------------------------------
def _copy_kernel(x_ref, o_ref):
    o_ref[...] = x_ref[...]


def clip_mock_forward(x):
    slab, n, rows, tile_rows = _lane_slab(x)
    grid = (_cdiv(rows, tile_rows),)
    out = pl.pallas_call(
        _copy_kernel,
        out_shape=jax.ShapeDtypeStruct(slab.shape, slab.dtype),
        grid_spec=pltpu.PrefetchScalarGridSpec(
            num_scalar_prefetch=0,
            grid=grid,
            in_specs=[pl.BlockSpec((tile_rows, LANE), lambda i: (i, 0))],
            out_specs=pl.BlockSpec((tile_rows, LANE), lambda i: (i, 0)),
        ),
        compiler_params=pltpu.CompilerParams(
            dimension_semantics=("parallel",),
            vmem_limit_bytes=VMEM_LIMIT_BYTES),
    )(slab)
    if rows * LANE == n:
        return out.reshape(x.shape)                    # free reshape
    return out.reshape(-1)[:n].reshape(x.shape)        # ragged fallback only


# ----------------------------------------------------------------------------
# encode_image(x) = x.mean() * tensor.repeat(B, 1)
#   Streaming reduction: VPU-only (8,128) accumulator in the hot loop,
#   single cross-lane reduce + scaled broadcast in the last-step epilogue.
# ----------------------------------------------------------------------------
def _encode_image_kernel(x_ref, t_ref, o_ref, acc_ref, *,
                         inv_n, n_rows, tile_rows, batch):
    pid = pl.program_id(0)
    last = pl.num_programs(0) - 1

    @pl.when(pid == 0)
    def _():
        acc_ref[...] = jnp.zeros_like(acc_ref)

    def accumulate(blk):
        # Fold sublane groups with vreg-wise adds (pure VPU); the one
        # cross-lane/sublane reduce happens only in the epilogue below.
        if tile_rows % 8 == 0:
            acc_ref[...] += blk.reshape(tile_rows // 8, 8, LANE).sum(axis=0)
        else:
            # Only reachable on the tiny single-block path where rows is not a
            # sublane multiple; one XLU sublane-reduce is negligible there.
            acc_ref[0:1, :] = acc_ref[0:1, :] + jnp.sum(blk, axis=0, keepdims=True)

    if n_rows % tile_rows == 0:
        accumulate(x_ref[...].astype(jnp.float32))
    else:
        # Ragged last block: rows beyond the array hold unspecified data; mask
        # them (only on the final step, so the hot loop stays unmasked).
        @pl.when(pid != last)
        def _():
            accumulate(x_ref[...].astype(jnp.float32))

        @pl.when(pid == last)
        def _():
            row = pid * tile_rows + jax.lax.broadcasted_iota(
                jnp.int32, (tile_rows, LANE), 0)
            blk = jnp.where(row < n_rows, x_ref[...].astype(jnp.float32), 0.0)
            accumulate(blk)

    @pl.when(pid == last)
    def _():
        scale = jnp.sum(acc_ref[...]) * jnp.float32(inv_n)   # mean over true n
        feat = t_ref[...].astype(jnp.float32) * scale        # (1, 512)
        o_ref[...] = jnp.broadcast_to(
            feat, (batch, feat.shape[-1])).astype(o_ref.dtype)


def clip_mock_encode_image(x, tensor):
    b = x.shape[0]
    d = tensor.shape[-1]
    slab, n, rows, tile_rows = _lane_slab(x)
    grid = (_cdiv(rows, tile_rows),)

    kernel = functools.partial(
        _encode_image_kernel,
        inv_n=1.0 / n, n_rows=rows, tile_rows=tile_rows, batch=b)

    return pl.pallas_call(
        kernel,
        out_shape=jax.ShapeDtypeStruct((b, d), tensor.dtype),
        grid_spec=pltpu.PrefetchScalarGridSpec(
            num_scalar_prefetch=0,
            grid=grid,
            in_specs=[
                pl.BlockSpec((tile_rows, LANE), lambda i: (i, 0)),
                pl.BlockSpec((1, d), lambda i: (0, 0)),
            ],
            out_specs=pl.BlockSpec((b, d), lambda i: (0, 0)),
            scratch_shapes=[pltpu.VMEM((8, LANE), jnp.float32)],
        ),
        # Reduction axis with a resident accumulator/output -> "arbitrary".
        compiler_params=pltpu.CompilerParams(
            dimension_semantics=("arbitrary",),
            vmem_limit_bytes=VMEM_LIMIT_BYTES),
    )(slab, tensor)


# ----------------------------------------------------------------------------
# encode_text(x) = tensor.repeat(B, 1)
#   Pure few-KiB broadcast; per perf review a kernel launch costs more than the
#   op itself, so no pallas_call here (the broadcast path is also exercised in
#   encode_image's epilogue).
# ----------------------------------------------------------------------------
def clip_mock_encode_text(x, tensor):
    return jnp.broadcast_to(tensor, (x.shape[0], tensor.shape[-1]))


if __name__ == "__main__":
    key = jax.random.PRNGKey(0)
    k_buf, k_x = jax.random.split(key)

    # Deterministic stand-in for the registered buffer torch.randn([1, 512]).
    tensor = jax.random.normal(k_buf, (1, 512), dtype=jnp.float32)

    # Small NCHW input consistent with an image-encoder mock.
    x = jax.random.normal(k_x, (2, 4, 16, 16), dtype=jnp.float32)

    # forward (== clip_mock_wrapper.forward): identity
    y = jax.block_until_ready(clip_mock_forward(x))
    assert y.shape == x.shape and y.dtype == x.dtype
    assert jnp.allclose(y, x)

    # encode_image: x.mean() * tensor.repeat(B, 1)
    img_feat = jax.block_until_ready(clip_mock_encode_image(x, tensor))
    ref_img = x.mean() * jnp.tile(tensor, (x.shape[0], 1))
    assert img_feat.shape == (2, 512)
    assert jnp.allclose(img_feat, ref_img, rtol=1e-5, atol=1e-5)

    # encode_text: tensor.repeat(B, 1)
    txt_feat = jax.block_until_ready(clip_mock_encode_text(x, tensor))
    ref_txt = jnp.tile(tensor, (x.shape[0], 1))
    assert txt_feat.shape == (2, 512)
    assert jnp.allclose(txt_feat, ref_txt)

    print("KERNEL_OK")
</pallas_src>

<mosaic_0001>
module attributes {stable_mosaic.version = 11 : i64} {
  func.func @_copy_kernel(%arg0: i32, %arg1: memref<16x128xf32, #tpu.memory_space<vmem>>, %arg2: memref<16x128xf32, #tpu.memory_space<vmem>>) attributes {dimension_semantics = [#tpu.dimension_semantics<parallel>], iteration_bounds = array<i64: 1>, scalar_prefetch = 0 : i64, scratch_operands = 0 : i64, tpu.core_type = #tpu.core_type<tc>, window_params = [{transform_indices = @transform_0, window_bounds = array<i64: 16, 128>}, {transform_indices = @transform_1, window_bounds = array<i64: 16, 128>}]} {
    %c0 = arith.constant 0 : index
    %c0_0 = arith.constant 0 : index
    %0 = vector.load %arg1[%c0, %c0_0] : memref<16x128xf32, #tpu.memory_space<vmem>>, vector<16x128xf32>
    %c0_1 = arith.constant 0 : index
    %c0_2 = arith.constant 0 : index
    %1 = vector.load %arg2[%c0_1, %c0_2] : memref<16x128xf32, #tpu.memory_space<vmem>>, vector<16x128xf32>
    tpu.vector_store %arg2[%c0_1, %c0_2], %0 {strides = array<i32>} : memref<16x128xf32, #tpu.memory_space<vmem>>, vector<16x128xf32>,
    return
  }
  func.func @transform_0(%arg0: i32) -> (i32, i32) {
    %c0_i32 = arith.constant 0 : i32
    %c0_i32_0 = arith.constant 0 : i32
    return %arg0, %c0_i32 : i32, i32
  }
  func.func @transform_1(%arg0: i32) -> (i32, i32) {
    %c0_i32 = arith.constant 0 : i32
    %c0_i32_0 = arith.constant 0 : i32
    return %arg0, %c0_i32 : i32, i32
  }
}

</mosaic_0001>

<bundles_post_ra>
// kernel: tpu_custom_call.1
= control target key start
LH: loop header
LB: loop body
LE: loop exit
PB: predicated region body
PF: predicated region fallthrough
CT: control target
= control target key end

     0   :  { %6 = vsyncpa [#allocation3], 0  ;;  %s134_s0 = inlined_call_operand.hbm [shape: f32[16,128], index: 0, kind: input, shape index: {}]   ;;  %s135_s1 = inlined_call_operand.hbm [shape: f32[16,128], index: 1, kind: output, shape index: {}]  }
   0x1   :  { %7 = vsyncpa [#allocation4], 0  ;;  %s96_s6 = smov [#allocation2]   ;;  %s48_s10 = scalar_lea.hbm %s134_s0, 256 }
   0x2   :  { %s13_s7 = sshll.u32 %s96_s6, 4  ;;  %p49_p0 = scmp.ne.s32.totalorder %s134_s0, %s48_s10  ;;  %s14_s7 = int_to_ptr.vmem [resolvable:$true] %s13_s7 }
   0x3   :  { %p52_p1 = scmp.lt.u32.totalorder %s48_s10, %s134_s0 }
   0x5   :  { %p54_p2 = pnand %p52_p1, %p49_p0 }
   0x7   :  { %57 = shalt.err (!%p54_p2)
}
   0x8   :  { %s58_s15 = scalar_lea.vmem %s14_s7, 256  ;;  %p63_p4 = scmp.lt.s32.totalorder %s14_s7, %s14_s7 }
   0x9   :  { %p59_p3 = scmp.ne.s32.totalorder %s14_s7, %s58_s15  ;;  %p64_p5 = scmp.lt.s32.totalorder %s58_s15, %s58_s15 }
   0xb   :  { %p65_p6 = por %p64_p5, %p63_p4 }
   0xd   :  { %p66_p7 = pnand %p65_p6, %p59_p3 }
   0xf   :  { %69 = shalt.err (!%p66_p7)
}
  0x10   :  { %s97_s16 = smov 128   ;;  %s98_s17 = smov 8  }
  0x11   :  { %19 = dma.hbm_to_vmem [thread:$0]  %s134_s0, 256, %s14_s7, [#allocation3], %s97_s16, %s97_s16, %s98_s17  }
  0x12   :  { %92 = dma.done.wait [#allocation3], 256  }
  0x13   :  { %93 = vsyncadd [#allocation3], 4294967040  ;;  %s99_s20 = smov [#allocation5]   ;;  %v23_v0 = vld [vmem:[#allocation2] sm:$0xff]  ;;  %v24_v1 = vld [vmem:[#allocation2 + $0x8] sm:$0xff] }
  0x14   :  { %s32_s21 = sshll.u32 %s99_s20, 4  ;;  %25 = vst [vmem:[#allocation5] sm:$0xff] %v23_v0  ;;  %26 = vst [vmem:[#allocation5 + $0x8] sm:$0xff] %v24_v1  ;;  %s33_s21 = int_to_ptr.vmem [resolvable:$true] %s32_s21 }
  0x15   :  { %s70_s22 = scalar_lea.vmem %s33_s21, 256  ;;  %p75_p9 = scmp.lt.s32.totalorder %s33_s21, %s33_s21 }
  0x16   :  { %p71_p8 = scmp.ne.s32.totalorder %s33_s21, %s70_s22  ;;  %p76_p10 = scmp.lt.s32.totalorder %s70_s22, %s70_s22 }
  0x18   :  { %p77_p11 = por %p76_p10, %p75_p9 }
  0x1a   :  { %p78_p12 = pnand %p77_p11, %p71_p8 }
  0x1c   :  { %81 = shalt.err (!%p78_p12)
}
  0x1d   :  { %s82_s0 = scalar_lea.hbm %s135_s1, 256 }
  0x1e   :  { %p83_p13 = scmp.ne.s32.totalorder %s135_s1, %s82_s0  ;;  %p86_p0 = scmp.lt.u32.totalorder %s82_s0, %s135_s1 }
  0x20   :  { %p88_p1 = pnand %p86_p0, %p83_p13 }
  0x22   :  { %91 = shalt.err (!%p88_p1)
}
  0x23   :  { %38 = dma.vmem_to_hbm [thread:$0]  %s33_s21, 256, %s135_s1, [#allocation4], %s97_s16, %s97_s16, %s98_s17  }
  0x24   :  { %94 = dma.done.wait [#allocation4], 256  }
  0x25   :  { %95 = vsyncadd [#allocation4], 4294967040 }
  0x26   :  { %42 = vsyncpa [#allocation3], 1 }
  0x27   :  { %43 = vsyncpa [#allocation4], 1 }

</bundles_post_ra>
